<compile_context>
chip_gen: v7x
topology: tpu7x:2x2x1
jax: 0.10.0
libtpu: 0.0.40
codegen_flags: <defaults>
</compile_context>

<pallas_src>
import math

import jax
import jax.numpy as jnp
from jax.experimental import pallas as pl
from jax.experimental.pallas import tpu as pltpu


def _round_up(x, m):
    return ((x + m - 1) // m) * m


def _swiglu_kernel(x_ref, wg_ref, wl_ref, bg_ref, bl_ref, beta_ref,
                   o_ref, acc_g_ref, acc_l_ref):
    # x_ref:  (tm, tk)   wg_ref/wl_ref: (tk, tn)   bg_ref/bl_ref: (1, tn)
    # beta_ref: (1,) in SMEM   o_ref: (tm, tn)   acc_*: (tm, tn) f32 scratch
    k = pl.program_id(2)

    @pl.when(k == 0)
    def _():
        acc_g_ref[...] = jnp.zeros_like(acc_g_ref)
        acc_l_ref[...] = jnp.zeros_like(acc_l_ref)

    x = x_ref[...]
    acc_g_ref[...] += jnp.dot(x, wg_ref[...], preferred_element_type=jnp.float32)
    acc_l_ref[...] += jnp.dot(x, wl_ref[...], preferred_element_type=jnp.float32)

    @pl.when(k == pl.num_programs(2) - 1)
    def _():
        g = acc_g_ref[...] + bg_ref[...].astype(jnp.float32)
        lin = acc_l_ref[...] + bl_ref[...].astype(jnp.float32)
        beta = beta_ref[0]                       # SMEM scalar -> splat
        swish_gate = g * jax.nn.sigmoid(beta * g)  # sigmoid on EUP
        o_ref[...] = (swish_gate * lin).astype(o_ref.dtype)


def swiglu(x, w_gate, b_gate, w_lin, b_lin, beta,
           *, tile_m=256, tile_n=512, tile_k=512):
    """x: (..., size); w_*: (size, size) in PyTorch (out, in) layout;
    b_*: (size,); beta: (1,). Returns same shape/dtype as x."""
    orig_shape = x.shape
    size = orig_shape[-1]
    assert w_gate.shape == (size, size) and w_lin.shape == (size, size)
    assert b_gate.shape == (size,) and b_lin.shape == (size,)

    M = math.prod(orig_shape[:-1])
    x2 = x.reshape(M, size)

    # Lane-dense padding: feature dims -> multiple of 128, rows -> multiple of 8.
    Kp = _round_up(size, 128)
    Np = _round_up(size, 128)
    tm = min(tile_m, _round_up(M, 8))
    Mp = _round_up(M, tm)
    tk = tile_k if Kp > tile_k else Kp
    Kp = _round_up(Kp, tk)
    tn = tile_n if Np > tile_n else Np
    Np = _round_up(Np, tn)

    x_p = jnp.zeros((Mp, Kp), x.dtype).at[:M, :size].set(x2)
    # Transpose weights once in the wrapper so the kernel does x @ W (K, N).
    wg_p = jnp.zeros((Kp, Np), w_gate.dtype).at[:size, :size].set(w_gate.T)
    wl_p = jnp.zeros((Kp, Np), w_lin.dtype).at[:size, :size].set(w_lin.T)
    bg_p = jnp.zeros((1, Np), jnp.float32).at[0, :size].set(b_gate.astype(jnp.float32))
    bl_p = jnp.zeros((1, Np), jnp.float32).at[0, :size].set(b_lin.astype(jnp.float32))
    beta_s = jnp.asarray(beta, jnp.float32).reshape(1)

    grid = (Mp // tm, Np // tn, Kp // tk)

    out_p = pl.pallas_call(
        _swiglu_kernel,
        out_shape=jax.ShapeDtypeStruct((Mp, Np), x.dtype),
        grid_spec=pltpu.PrefetchScalarGridSpec(
            num_scalar_prefetch=0,
            grid=grid,
            in_specs=[
                pl.BlockSpec((tm, tk), lambda i, j, k: (i, k)),   # x
                pl.BlockSpec((tk, tn), lambda i, j, k: (k, j)),   # W_gate
                pl.BlockSpec((tk, tn), lambda i, j, k: (k, j)),   # W_lin
                pl.BlockSpec((1, tn), lambda i, j, k: (0, j)),    # b_gate
                pl.BlockSpec((1, tn), lambda i, j, k: (0, j)),    # b_lin
                pl.BlockSpec(memory_space=pltpu.MemorySpace.SMEM),  # beta
            ],
            out_specs=pl.BlockSpec((tm, tn), lambda i, j, k: (i, j)),
            scratch_shapes=[
                pltpu.VMEM((tm, tn), jnp.float32),   # gate accumulator
                pltpu.VMEM((tm, tn), jnp.float32),   # linear accumulator
            ],
        ),
        compiler_params=pltpu.CompilerParams(
            dimension_semantics=("parallel", "parallel", "arbitrary"),
        ),
    )(x_p, wg_p, wl_p, bg_p, bl_p, beta_s)

    return out_p[:M, :size].reshape(orig_shape)


def swiglu_ref(x, w_gate, b_gate, w_lin, b_lin, beta):
    hp = jax.lax.Precision.HIGHEST
    g = jnp.dot(x, w_gate.T, precision=hp) + b_gate
    lin = jnp.dot(x, w_lin.T, precision=hp) + b_lin
    return (g * jax.nn.sigmoid(beta * g)) * lin


if __name__ == "__main__":
    key = jax.random.PRNGKey(0)
    k1, k2, k3, k4, k5 = jax.random.split(key, 5)

    B, S, size = 2, 8, 32
    x = jax.random.normal(k1, (B, S, size), dtype=jnp.float32)

    # nn.Linear-style init: U(-1/sqrt(size), 1/sqrt(size))
    bound = 1.0 / (size ** 0.5)
    w_gate = jax.random.uniform(k2, (size, size), jnp.float32, -bound, bound)
    b_gate = jax.random.uniform(k3, (size,), jnp.float32, -bound, bound)
    w_lin = jax.random.uniform(k4, (size, size), jnp.float32, -bound, bound)
    b_lin = jax.random.uniform(k5, (size,), jnp.float32, -bound, bound)
    beta = jnp.ones((1,), jnp.float32)   # matches nn.Parameter(torch.ones(1))

    out = swiglu(x, w_gate, b_gate, w_lin, b_lin, beta)
    jax.block_until_ready(out)

    ref = swiglu_ref(x, w_gate, b_gate, w_lin, b_lin, beta)
    assert out.shape == ref.shape
    assert jnp.allclose(out, ref, atol=1e-4, rtol=1e-4), "mismatch vs reference"

    print("KERNEL_OK")
</pallas_src>

<mosaic_0001>
module attributes {stable_mosaic.version = 11 : i64} {
  func.func @_swiglu_kernel(%arg0: i32, %arg1: i32, %arg2: i32, %arg3: memref<16x128xf32, #tpu.memory_space<vmem>>, %arg4: memref<128x128xf32, #tpu.memory_space<vmem>>, %arg5: memref<128x128xf32, #tpu.memory_space<vmem>>, %arg6: memref<1x128xf32, #tpu.memory_space<vmem>>, %arg7: memref<1x128xf32, #tpu.memory_space<vmem>>, %arg8: memref<1xf32, #tpu.memory_space<smem>>, %arg9: memref<16x128xf32, #tpu.memory_space<vmem>>, %arg10: memref<16x128xf32, #tpu.memory_space<vmem>>, %arg11: memref<16x128xf32, #tpu.memory_space<vmem>>) attributes {dimension_semantics = [#tpu.dimension_semantics<parallel>, #tpu.dimension_semantics<parallel>, #tpu.dimension_semantics<arbitrary>], iteration_bounds = array<i64: 1, 1, 1>, scalar_prefetch = 0 : i64, scratch_operands = 2 : i64, tpu.core_type = #tpu.core_type<tc>, window_params = [{transform_indices = @transform_0, window_bounds = array<i64: 16, 128>}, {transform_indices = @transform_1, window_bounds = array<i64: 128, 128>}, {transform_indices = @transform_2, window_bounds = array<i64: 128, 128>}, {transform_indices = @transform_3, window_bounds = array<i64: 1, 128>}, {transform_indices = @transform_4, window_bounds = array<i64: 1, 128>}, {transform_indices = @transform_5, window_bounds = array<i64: 1>}, {transform_indices = @transform_6, window_bounds = array<i64: 16, 128>}]} {
    %c0_i32 = arith.constant 0 : i32
    %0 = arith.cmpi eq, %arg2, %c0_i32 : i32
    %1 = arith.extui %0 : i1 to i32
    %c0_i32_0 = arith.constant 0 : i32
    %2 = arith.cmpi ne, %1, %c0_i32_0 : i32
    scf.if %2 {
      %cst_17 = arith.constant 0.000000e+00 : f32
      %17 = vector.broadcast %cst_17 : f32 to vector<16x128xf32>
      %c0_18 = arith.constant 0 : index
      %c0_19 = arith.constant 0 : index
      %18 = vector.load %arg10[%c0_18, %c0_19] : memref<16x128xf32, #tpu.memory_space<vmem>>, vector<16x128xf32>
      tpu.vector_store %arg10[%c0_18, %c0_19], %17 {strides = array<i32>} : memref<16x128xf32, #tpu.memory_space<vmem>>, vector<16x128xf32>,
      %cst_20 = arith.constant 0.000000e+00 : f32
      %19 = vector.broadcast %cst_20 : f32 to vector<16x128xf32>
      %c0_21 = arith.constant 0 : index
      %c0_22 = arith.constant 0 : index
      %20 = vector.load %arg11[%c0_21, %c0_22] : memref<16x128xf32, #tpu.memory_space<vmem>>, vector<16x128xf32>
      tpu.vector_store %arg11[%c0_21, %c0_22], %19 {strides = array<i32>} : memref<16x128xf32, #tpu.memory_space<vmem>>, vector<16x128xf32>,
    } else {
    }
    %c0 = arith.constant 0 : index
    %c0_1 = arith.constant 0 : index
    %3 = vector.load %arg3[%c0, %c0_1] : memref<16x128xf32, #tpu.memory_space<vmem>>, vector<16x128xf32>
    %c0_2 = arith.constant 0 : index
    %c0_3 = arith.constant 0 : index
    %4 = vector.load %arg10[%c0_2, %c0_3] : memref<16x128xf32, #tpu.memory_space<vmem>>, vector<16x128xf32>
    %c0_4 = arith.constant 0 : index
    %c0_5 = arith.constant 0 : index
    %5 = vector.load %arg4[%c0_4, %c0_5] : memref<128x128xf32, #tpu.memory_space<vmem>>, vector<128x128xf32>
    %cst = arith.constant dense<0.000000e+00> : vector<16x128xf32>
    %6 = tpu.matmul %3, %5, %cst {dimension_numbers = #tpu.dot_dimension_numbers<[1], [0], [0], [1], [0, 0, 1, 1], [], []>} : vector<16x128xf32>, vector<128x128xf32>, vector<16x128xf32> -> vector<16x128xf32>
    %7 = arith.addf %4, %6 : vector<16x128xf32>
    %c0_6 = arith.constant 0 : index
    %c0_7 = arith.constant 0 : index
    %8 = vector.load %arg10[%c0_6, %c0_7] : memref<16x128xf32, #tpu.memory_space<vmem>>, vector<16x128xf32>
    tpu.vector_store %arg10[%c0_6, %c0_7], %7 {strides = array<i32>} : memref<16x128xf32, #tpu.memory_space<vmem>>, vector<16x128xf32>,
    %c0_8 = arith.constant 0 : index
    %c0_9 = arith.constant 0 : index
    %9 = vector.load %arg11[%c0_8, %c0_9] : memref<16x128xf32, #tpu.memory_space<vmem>>, vector<16x128xf32>
    %c0_10 = arith.constant 0 : index
    %c0_11 = arith.constant 0 : index
    %10 = vector.load %arg5[%c0_10, %c0_11] : memref<128x128xf32, #tpu.memory_space<vmem>>, vector<128x128xf32>
    %cst_12 = arith.constant dense<0.000000e+00> : vector<16x128xf32>
    %11 = tpu.matmul %3, %10, %cst_12 {dimension_numbers = #tpu.dot_dimension_numbers<[1], [0], [0], [1], [0, 0, 1, 1], [], []>} : vector<16x128xf32>, vector<128x128xf32>, vector<16x128xf32> -> vector<16x128xf32>
    %12 = arith.addf %9, %11 : vector<16x128xf32>
    %c0_13 = arith.constant 0 : index
    %c0_14 = arith.constant 0 : index
    %13 = vector.load %arg11[%c0_13, %c0_14] : memref<16x128xf32, #tpu.memory_space<vmem>>, vector<16x128xf32>
    tpu.vector_store %arg11[%c0_13, %c0_14], %12 {strides = array<i32>} : memref<16x128xf32, #tpu.memory_space<vmem>>, vector<16x128xf32>,
    %c0_i32_15 = arith.constant 0 : i32
    %14 = arith.cmpi eq, %arg2, %c0_i32_15 : i32
    %15 = arith.extui %14 : i1 to i32
    %c0_i32_16 = arith.constant 0 : i32
    %16 = arith.cmpi ne, %15, %c0_i32_16 : i32
    scf.if %16 {
      %c0_17 = arith.constant 0 : index
      %c0_18 = arith.constant 0 : index
      %17 = vector.load %arg10[%c0_17, %c0_18] : memref<16x128xf32, #tpu.memory_space<vmem>>, vector<16x128xf32>
      %c0_19 = arith.constant 0 : index
      %c0_20 = arith.constant 0 : index
      %18 = vector.load %arg6[%c0_19, %c0_20] : memref<1x128xf32, #tpu.memory_space<vmem>>, vector<1x128xf32>
      %19 = vector.broadcast %18 : vector<1x128xf32> to vector<16x128xf32>
      %20 = arith.addf %17, %19 : vector<16x128xf32>
      %c0_21 = arith.constant 0 : index
      %c0_22 = arith.constant 0 : index
      %21 = vector.load %arg11[%c0_21, %c0_22] : memref<16x128xf32, #tpu.memory_space<vmem>>, vector<16x128xf32>
      %c0_23 = arith.constant 0 : index
      %c0_24 = arith.constant 0 : index
      %22 = vector.load %arg7[%c0_23, %c0_24] : memref<1x128xf32, #tpu.memory_space<vmem>>, vector<1x128xf32>
      %23 = vector.broadcast %22 : vector<1x128xf32> to vector<16x128xf32>
      %24 = arith.addf %21, %23 : vector<16x128xf32>
      %c0_25 = arith.constant 0 : index
      %25 = memref.load %arg8[%c0_25] : memref<1xf32, #tpu.memory_space<smem>>
      %26 = vector.broadcast %25 : f32 to vector<16x128xf32>
      %27 = arith.mulf %26, %20 : vector<16x128xf32>
      %28 = arith.negf %27 : vector<16x128xf32>
      %29 = math.exp %28 : vector<16x128xf32>
      %cst_26 = arith.constant 1.000000e+00 : f32
      %30 = vector.broadcast %cst_26 : f32 to vector<16x128xf32>
      %31 = arith.addf %30, %29 : vector<16x128xf32>
      %32 = arith.divf %30, %31 : vector<16x128xf32>
      %33 = arith.mulf %20, %32 : vector<16x128xf32>
      %34 = arith.mulf %33, %24 : vector<16x128xf32>
      %c0_27 = arith.constant 0 : index
      %c0_28 = arith.constant 0 : index
      %35 = vector.load %arg9[%c0_27, %c0_28] : memref<16x128xf32, #tpu.memory_space<vmem>>, vector<16x128xf32>
      tpu.vector_store %arg9[%c0_27, %c0_28], %34 {strides = array<i32>} : memref<16x128xf32, #tpu.memory_space<vmem>>, vector<16x128xf32>,
    } else {
    }
    return
  }
  func.func @transform_0(%arg0: i32, %arg1: i32, %arg2: i32) -> (i32, i32) {
    %c0_i32 = arith.constant 0 : i32
    return %arg0, %arg2 : i32, i32
  }
  func.func @transform_1(%arg0: i32, %arg1: i32, %arg2: i32) -> (i32, i32) {
    %c0_i32 = arith.constant 0 : i32
    return %arg2, %arg1 : i32, i32
  }
  func.func @transform_2(%arg0: i32, %arg1: i32, %arg2: i32) -> (i32, i32) {
    %c0_i32 = arith.constant 0 : i32
    return %arg2, %arg1 : i32, i32
  }
  func.func @transform_3(%arg0: i32, %arg1: i32, %arg2: i32) -> (i32, i32) {
    %c0_i32 = arith.constant 0 : i32
    %c0_i32_0 = arith.constant 0 : i32
    return %c0_i32, %arg1 : i32, i32
  }
  func.func @transform_4(%arg0: i32, %arg1: i32, %arg2: i32) -> (i32, i32) {
    %c0_i32 = arith.constant 0 : i32
    %c0_i32_0 = arith.constant 0 : i32
    return %c0_i32, %arg1 : i32, i32
  }
  func.func @transform_5(%arg0: i32, %arg1: i32, %arg2: i32) -> i32 {
    %c0_i32 = arith.constant 0 : i32
    %c0_i32_0 = arith.constant 0 : i32
    return %c0_i32 : i32
  }
  func.func @transform_6(%arg0: i32, %arg1: i32, %arg2: i32) -> (i32, i32) {
    %c0_i32 = arith.constant 0 : i32
    return %arg0, %arg1 : i32, i32
  }
}

</mosaic_0001>

<bundles_post_ra>
// kernel: tpu_custom_call.1
= control target key start
LH: loop header
LB: loop body
LE: loop exit
PB: predicated region body
PF: predicated region fallthrough
CT: control target
= control target key end

     0   :  { %12 = vsyncpa [#allocation6], 0  ;;  %s734_s0 = inlined_call_operand.hbm [shape: f32[16,128], index: 0, kind: input, shape index: {}]   ;;  %s735_s1 = inlined_call_operand.hbm [shape: f32[128,128], index: 1, kind: input, shape index: {}]   ;;  %s736_s2 = inlined_call_operand.hbm [shape: f32[128,128], index: 2, kind: input, shape index: {}]   ;;  %s737_s3 = inlined_call_operand.vmem [shape: f32[1,128], index: 3, kind: input, shape index: {}]   ;;  %s738_s4 = inlined_call_operand.vmem [shape: f32[1,128], index: 4, kind: input, shape index: {}]   ;;  %s739_s5 = inlined_call_operand.<no memory space> [shape: f32[1], index: 5, kind: input, shape index: {}]   ;;  %s740_s6 = inlined_call_operand.hbm [shape: f32[16,128], index: 6, kind: output, shape index: {}]  }
   0x1   :  { %13 = vsyncpa [#allocation9], 0 }
   0x2   :  { %14 = vsyncpa [#allocation7], 0  ;;  %s617_s21 = smov [#allocation8]   ;;  %s618_s23 = smov [#allocation5]  }
   0x3   :  { %s32_s22 = sshll.u32 %s617_s21, 4  ;;  %s20_s24 = sshll.u32 %s618_s23, 4  ;;  %s33_s22 = int_to_ptr.vmem [resolvable:$true] %s32_s22  ;;  %s658_s24 = int_to_ptr.vmem [resolvable:$true] %s20_s24 }
   0x4   :  { %s523_s27 = scalar_lea.hbm %s735_s1, 2048 }
   0x5   :  { %p524_p0 = scmp.ne.s32.totalorder %s735_s1, %s523_s27  ;;  %p527_p1 = scmp.lt.u32.totalorder %s523_s27, %s735_s1 }
   0x7   :  { %p529_p2 = pnand %p527_p1, %p524_p0 }
   0x9   :  { %532 = shalt.err (!%p529_p2)
}
   0xa   :  { %s533_s8 = scalar_lea.vmem %s33_s22, 2048  ;;  %p538_p4 = scmp.lt.s32.totalorder %s33_s22, %s33_s22 }
   0xb   :  { %p534_p3 = scmp.ne.s32.totalorder %s33_s22, %s533_s8  ;;  %p539_p5 = scmp.lt.s32.totalorder %s533_s8, %s533_s8 }
   0xd   :  { %p540_p6 = por %p539_p5, %p538_p4 }
   0xf   :  { %p541_p7 = pnand %p540_p6, %p534_p3 }
  0x11   :  { %544 = shalt.err (!%p541_p7)
}
  0x12   :  { %s619_s9 = smov 128   ;;  %s620_s10 = smov 8  }
  0x13   :  { %38 = dma.hbm_to_vmem [thread:$0]  %s735_s1, 2048, %s33_s22, [#allocation9], %s619_s9, %s619_s9, %s620_s10  }
  0x14   :  { %s545_s15 = scalar_lea.hbm %s734_s0, 256 }
  0x15   :  { %p546_p8 = scmp.ne.s32.totalorder %s734_s0, %s545_s15  ;;  %p549_p9 = scmp.lt.u32.totalorder %s545_s15, %s734_s0 }
  0x17   :  { %p551_p10 = pnand %p549_p9, %p546_p8 }
  0x19   :  { %554 = shalt.err (!%p551_p10)
}
  0x1a   :  { %s555_s20 = scalar_lea.vmem %s658_s24, 256  ;;  %p560_p12 = scmp.lt.s32.totalorder %s658_s24, %s658_s24 }
  0x1b   :  { %p556_p11 = scmp.ne.s32.totalorder %s658_s24, %s555_s20  ;;  %p561_p13 = scmp.lt.s32.totalorder %s555_s20, %s555_s20 }
  0x1d   :  { %p562_p0 = por %p561_p13, %p560_p12 }
  0x1f   :  { %p563_p1 = pnand %p562_p0, %p556_p11 }
  0x21   :  { %566 = shalt.err (!%p563_p1)
}
  0x22   :  { %26 = dma.hbm_to_vmem [thread:$0]  %s734_s0, 256, %s658_s24, [#allocation6], %s619_s9, %s619_s9, %s620_s10  }
  0x23   :  { %s621_s22 = smov [#allocation10]   ;;  %s567_s27 = scalar_lea.hbm %s736_s2, 2048 }
  0x24   :  { %s44_s23 = sshll.u32 %s621_s22, 4  ;;  %p568_p2 = scmp.ne.s32.totalorder %s736_s2, %s567_s27  ;;  %s45_s23 = int_to_ptr.vmem [resolvable:$true] %s44_s23 }
  0x25   :  { %p571_p3 = scmp.lt.u32.totalorder %s567_s27, %s736_s2 }
  0x27   :  { %p573_p4 = pnand %p571_p3, %p568_p2 }
  0x29   :  { %576 = shalt.err (!%p573_p4)
}
  0x2a   :  { %s577_s8 = scalar_lea.vmem %s45_s23, 2048  ;;  %p582_p6 = scmp.lt.s32.totalorder %s45_s23, %s45_s23 }
  0x2b   :  { %p578_p5 = scmp.ne.s32.totalorder %s45_s23, %s577_s8  ;;  %p583_p7 = scmp.lt.s32.totalorder %s577_s8, %s577_s8 }
  0x2d   :  { %p584_p8 = por %p583_p7, %p582_p6 }
  0x2f   :  { %p585_p9 = pnand %p584_p8, %p578_p5 }
  0x31   :  { %588 = shalt.err (!%p585_p9)
}
  0x32   :  { %50 = dma.hbm_to_vmem [thread:$0]  %s736_s2, 2048, %s45_s23, [#allocation9], %s619_s9, %s619_s9, %s620_s10  }
  0x33   :  { %611 = dma.done.wait [#allocation6], 256  }
  0x34   :  { %612 = vsyncadd [#allocation6], 4294967040 }
  0x35   :  { %613 = dma.done.wait [#allocation9], 4096  }
  0x36   :  { %614 = vsyncadd [#allocation9], 4294963200  ;;  %v78_v0 = vld [vmem:[#allocation8] sm:$0xff]  ;;  %v79_v1 = vld [vmem:[#allocation8 + $0x8] sm:$0xff]  ;;  %v296_v52 = vstv %s739_s5  ;;  %s622_s5 = smov [#allocation11]  }
  0x37   :  { %v80_v2 = vld [vmem:[#allocation8 + $0x10] sm:$0xff]  ;;  %v445_v3 = vpack.c.bf16 %v79_v1, %v78_v0  ;;  %v81_v4 = vld [vmem:[#allocation8 + $0x18] sm:$0xff]  ;;  %v82_v6 = vld [vmem:[#allocation8 + $0x20] sm:$0xff]  ;;  %s322_s15 = sshll.u32 %s622_s5, 4  ;;  %s323_s15 = int_to_ptr.vmem [resolvable:$true] %s322_s15 }
  0x38   :  { %v449_v5 = vpack.c.bf16 %v81_v4, %v80_v2  ;;  %v83_v7 = vld [vmem:[#allocation8 + $0x28] sm:$0xff]  ;;  %v84_v9 = vld [vmem:[#allocation8 + $0x30] sm:$0xff]  ;;  %v175_v10 = vld [vmem:[#allocation10] sm:$0xff]  ;;  %s589_s16 = scalar_lea.vmem %s323_s15, 256  ;;  %p594_p11 = scmp.lt.s32.totalorder %s323_s15, %s323_s15 }
  0x39   :  { %446 = vmatprep.subr.bf16.mxu0 %v445_v3  ;;  %v453_v8 = vpack.c.bf16 %v83_v7, %v82_v6  ;;  %v176_v11 = vld [vmem:[#allocation10 + $0x8] sm:$0xff]  ;;  %v85_v12 = vld [vmem:[#allocation8 + $0x38] sm:$0xff]  ;;  %v74_v14 = vld [vmem:[#allocation5] sm:$0xff]  ;;  %p590_p10 = scmp.ne.s32.totalorder %s323_s15, %s589_s16  ;;  %p595_p12 = scmp.lt.s32.totalorder %s589_s16, %s589_s16 }
  0x3a   :  { %448 = vmatpush3.bf16.msra.mxu0 %v445_v3  ;;  %v477_v13 = vpack.c.bf16 %v176_v11, %v175_v10  ;;  %v177_v15 = vld [vmem:[#allocation10 + $0x10] sm:$0xff]  ;;  %407 = vmatprep.mubr.f32.mxu0 %v74_v14  ;;  %v178_v16 = vld [vmem:[#allocation10 + $0x18] sm:$0xff]  ;;  %v179_v17 = vld [vmem:[#allocation10 + $0x20] sm:$0xff]  ;;  %v457_v20 = vpack.c.bf16 %v85_v12, %v84_v9 }
  0x3b   :  { %450 = vmatprep.subr.bf16.mxu0 %v449_v5  ;;  %v180_v18 = vld [vmem:[#allocation10 + $0x28] sm:$0xff]  ;;  %442 = vmatprep.mubr.f32.mxu1 %v74_v14  ;;  %v481_v19 = vpack.c.bf16 %v178_v16, %v177_v15  ;;  %v86_v21 = vld [vmem:[#allocation8 + $0x40] sm:$0xff]  ;;  %v181_v24 = vld [vmem:[#allocation10 + $0x30] sm:$0xff]  ;;  %p596_p13 = por %p595_p12, %p594_p11 }
  0x3c   :  { %478 = vmatprep.subr.bf16.mxu1 %v477_v13  ;;  %v87_v22 = vld [vmem:[#allocation8 + $0x48] sm:$0xff]  ;;  %v485_v23 = vpack.c.bf16 %v180_v18, %v179_v17  ;;  %v182_v25 = vld [vmem:[#allocation10 + $0x38] sm:$0xff]  ;;  %v88_v27 = vld [vmem:[#allocation8 + $0x50] sm:$0xff] }
  0x3d   :  { %480 = vmatpush3.bf16.msra.mxu1 %v477_v13  ;;  %v461_v26 = vpack.c.bf16 %v87_v22, %v86_v21  ;;  %v89_v28 = vld [vmem:[#allocation8 + $0x58] sm:$0xff]  ;;  %v489_v29 = vpack.c.bf16 %v182_v25, %v181_v24  ;;  %v183_v30 = vld [vmem:[#allocation10 + $0x40] sm:$0xff]  ;;  %v184_v31 = vld [vmem:[#allocation10 + $0x48] sm:$0xff]  ;;  %p597_p0 = pnand %p596_p13, %p590_p10 }
  0x3e   :  { %452 = vmatpush3.bf16.msra.mxu0 %v449_v5  ;;  %482 = vmatprep.subr.bf16.mxu1 %v481_v19  ;;  %v465_v32 = vpack.c.bf16 %v89_v28, %v88_v27  ;;  %v90_v33 = vld [vmem:[#allocation8 + $0x60] sm:$0xff]  ;;  %v91_v34 = vld [vmem:[#allocation8 + $0x68] sm:$0xff]  ;;  %v493_v35 = vpack.c.bf16 %v184_v31, %v183_v30  ;;  %v185_v36 = vld [vmem:[#allocation10 + $0x50] sm:$0xff] }
  0x3f   :  { %454 = vmatprep.subr.bf16.mxu0 %v453_v8  ;;  %v186_v37 = vld [vmem:[#allocation10 + $0x58] sm:$0xff]  ;;  %v469_v38 = vpack.c.bf16 %v91_v34, %v90_v33  ;;  %v92_v39 = vld [vmem:[#allocation8 + $0x70] sm:$0xff]  ;;  %v187_v42 = vld [vmem:[#allocation10 + $0x60] sm:$0xff] }
  0x40   :  { %v93_v40 = vld [vmem:[#allocation8 + $0x78] sm:$0xff]  ;;  %v497_v41 = vpack.c.bf16 %v186_v37, %v185_v36  ;;  %v188_v43 = vld [vmem:[#allocation10 + $0x68] sm:$0xff]  ;;  %v189_v46 = vld [vmem:[#allocation10 + $0x70] sm:$0xff] }
  0x41   :  { %484 = vmatpush3.bf16.msra.mxu1 %v481_v19  ;;  %v473_v44 = vpack.c.bf16 %v93_v40, %v92_v39  ;;  %v501_v45 = vpack.c.bf16 %v188_v43, %v187_v42  ;;  %v190_v47 = vld [vmem:[#allocation10 + $0x78] sm:$0xff]  ;;  %v335_v50 = vld [vmem:[%s737_s3] ss:$0 sm:$0xff] }
  0x42   :  { %456 = vmatpush3.bf16.msra.mxu0 %v453_v8  ;;  %486 = vmatprep.subr.bf16.mxu1 %v485_v23  ;;  %v505_v48 = vpack.c.bf16 %v190_v47, %v189_v46  ;;  %v75_v49 = vld [vmem:[#allocation5 + $0x8] sm:$0xff]  ;;  %v336_v2 = vld [vmem:[%s738_s4] ss:$0 sm:$0xff] }
  0x43   :  { %458 = vmatprep.subr.bf16.mxu0 %v457_v20 }
  0x45   :  { %488 = vmatpush3.bf16.msra.mxu1 %v485_v23 }
  0x46   :  { %460 = vmatpush3.bf16.msra.mxu0 %v457_v20  ;;  %490 = vmatprep.subr.bf16.mxu1 %v489_v29 }
  0x47   :  { %462 = vmatprep.subr.bf16.mxu0 %v461_v26 }
  0x49   :  { %492 = vmatpush3.bf16.msra.mxu1 %v489_v29 }
  0x4a   :  { %464 = vmatpush3.bf16.msra.mxu0 %v461_v26  ;;  %494 = vmatprep.subr.bf16.mxu1 %v493_v35 }
  0x4b   :  { %466 = vmatprep.subr.bf16.mxu0 %v465_v32 }
  0x4d   :  { %496 = vmatpush3.bf16.msra.mxu1 %v493_v35 }
  0x4e   :  { %468 = vmatpush3.bf16.msra.mxu0 %v465_v32  ;;  %498 = vmatprep.subr.bf16.mxu1 %v497_v41 }
  0x4f   :  { %470 = vmatprep.subr.bf16.mxu0 %v469_v38 }
  0x51   :  { %500 = vmatpush3.bf16.msra.mxu1 %v497_v41 }
  0x52   :  { %472 = vmatpush3.bf16.msra.mxu0 %v469_v38  ;;  %502 = vmatprep.subr.bf16.mxu1 %v501_v45 }
  0x53   :  { %474 = vmatprep.subr.bf16.mxu0 %v473_v44 }
  0x55   :  { %504 = vmatpush3.bf16.msra.mxu1 %v501_v45 }
  0x56   :  { %476 = vmatpush3.bf16.msra.mxu0 %v473_v44  ;;  %506 = vmatprep.subr.bf16.mxu1 %v505_v48 }
  0x59   :  { %408 = vmatmul.mubr.f32.vlgmr.msra.gmra.mrb[0].mxu0 %v75_v49  ;;  %508 = vmatpush3.bf16.msra.mxu1 %v505_v48 }
  0x5c   :  { %443 = vmatmul.mubr.f32.vlgmr.msra.gmra.mrb[0].mxu1 %v75_v49 }
 0x12c   :  { %v409_v51 = vpop.f32.mrb[0].mxu0 }
 0x12d   :  { %v283_v53 = vadd.f32 %v409_v51, %v335_v50  ;;  %v160_v54 = vpop.f32.mrb[1].mxu0 }
 0x12e   :  { %v282_v55 = vadd.f32 %v335_v50, %v160_v54 }
 0x12f   :  { %v298_v56 = vmul.f32 %v296_v52, %v283_v53  ;;  %v444_v59 = vpop.f32.mrb[0].mxu1 }
 0x130   :  { %v297_v57 = vmul.f32 %v296_v52, %v282_v55  ;;  %v257_v61 = vpop.f32.mrb[1].mxu1  ;;  %v294_v3 = vadd.f32 %v444_v59, %v336_v2 }
 0x131   :  { %v338_v58 = vmul.f32 -1.442695, %v298_v56  ;;  %v293_v5 = vadd.f32 %v336_v2, %v257_v61 }
 0x132   :  { %v337_v60 = vmul.f32 -1.442695, %v297_v57 }
 0x133   :  { %515 = vpow2.f32 %v338_v58 }
 0x134   :  { %517 = vpow2.f32 %v337_v60 }
 0x13d   :  { %v516_v62 = vpop.eup %515 }
 0x13e   :  { %v518_v63 = vpop.eup %517  ;;  %v306_v0 = vadd.f32 1.0, %v516_v62 }
 0x13f   :  { %v305_v1 = vadd.f32 1.0, %v518_v63 }
 0x140   :  { %519 = vrcp.f32 %v306_v0 }
 0x141   :  { %521 = vrcp.f32 %v305_v1 }
 0x14a   :  { %v520_v4 = vpop.eup %519 }
 0x14b   :  { %v522_v6 = vpop.eup %521  ;;  %v312_v7 = vmul.f32 %v520_v4, %v283_v53 }
 0x14c   :  { %v311_v8 = vmul.f32 %v522_v6, %v282_v55 }
 0x14d   :  { %v314_v9 = vmul.f32 %v312_v7, %v294_v3 }
 0x14e   :  { %v313_v10 = vmul.f32 %v311_v8, %v293_v5 }
 0x14f   :  { %316 = vst [vmem:[#allocation11 + $0x8] sm:$0xff] %v314_v9 }
 0x150   :  { %315 = vst [vmem:[#allocation11] sm:$0xff] %v313_v10 }
 0x151   :  { %600 = shalt.err (!%p597_p0)
}
 0x152   :  { %s601_s18 = scalar_lea.hbm %s740_s6, 256 }
 0x153   :  { %p602_p1 = scmp.ne.s32.totalorder %s740_s6, %s601_s18  ;;  %p605_p2 = scmp.lt.u32.totalorder %s601_s18, %s740_s6 }
 0x155   :  { %p607_p3 = pnand %p605_p2, %p602_p1 }
 0x157   :  { %610 = shalt.err (!%p607_p3)
}
 0x158   :  { %328 = dma.vmem_to_hbm [thread:$0]  %s323_s15, 256, %s740_s6, [#allocation7], %s619_s9, %s619_s9, %s620_s10  }
 0x159   :  { %615 = dma.done.wait [#allocation7], 256  }
 0x15a   :  { %616 = vsyncadd [#allocation7], 4294967040 }
 0x15b   :  { %332 = vsyncpa [#allocation6], 1 }
 0x15c   :  { %333 = vsyncpa [#allocation9], 1 }
 0x15d   :  { %334 = vsyncpa [#allocation7], 1 }

</bundles_post_ra>
